<compile_context>
chip_gen: v7x
topology: tpu7x:2x2x1
jax: 0.10.0
libtpu: 0.0.40
codegen_flags: <defaults>
</compile_context>

<pallas_src>
import functools
import math

import jax
import jax.numpy as jnp
from jax import lax
from jax.experimental import pallas as pl
from jax.experimental.pallas import tpu as pltpu

NEG_SLOPE = 0.01   # nn.LeakyReLU default
IN_EPS = 1e-5      # nn.InstanceNorm2d default


def _round_up(x, m):
    return ((x + m - 1) // m) * m


# --------------------------------------------------------------------------------------
# Tiled matmul kernel (MXU): bf16 operands, f32 accumulator, optional fused activation
# --------------------------------------------------------------------------------------

def _matmul_kernel(a_ref, b_ref, bias_ref, o_ref, acc_ref, *, act):
    @pl.when(pl.program_id(2) == 0)
    def _init():
        acc_ref[...] = jnp.zeros_like(acc_ref)

    acc_ref[...] += jnp.dot(a_ref[...], b_ref[...],
                            preferred_element_type=jnp.float32)

    @pl.when(pl.program_id(2) == pl.num_programs(2) - 1)
    def _finalize():
        acc = acc_ref[...] + bias_ref[...]
        if act == "relu":
            acc = jnp.maximum(acc, 0.0)
        elif act == "leaky_relu":
            acc = jnp.where(acc >= 0.0, acc, NEG_SLOPE * acc)
        elif act == "tanh":
            acc = jnp.tanh(acc)
        o_ref[...] = acc.astype(o_ref.dtype)


def matmul(a, b, bias=None, act="none", out_dtype=jnp.float32):
    """a:[M,K] @ b:[K,N] + bias, fused activation.  bf16 MXU inputs, f32 accumulation."""
    M, K = a.shape
    K2, N = b.shape
    assert K == K2
    TM = min(256, _round_up(M, 8))
    TN = min(256, _round_up(N, 128))
    TK = min(2048, _round_up(K, 128))
    Mp, Np, Kp = _round_up(M, TM), _round_up(N, TN), _round_up(K, TK)

    a_p = jnp.pad(a.astype(jnp.bfloat16), ((0, Mp - M), (0, Kp - K)))
    b_p = jnp.pad(b.astype(jnp.bfloat16), ((0, Kp - K), (0, Np - N)))
    if bias is None:
        bias_p = jnp.zeros((1, Np), jnp.float32)
    else:
        bias_p = jnp.pad(bias.astype(jnp.float32).reshape(1, N), ((0, 0), (0, Np - N)))

    grid = (Mp // TM, Np // TN, Kp // TK)
    out = pl.pallas_call(
        functools.partial(_matmul_kernel, act=act),
        grid_spec=pltpu.PrefetchScalarGridSpec(
            num_scalar_prefetch=0,
            grid=grid,
            in_specs=[
                pl.BlockSpec((TM, TK), lambda i, j, k: (i, k)),
                pl.BlockSpec((TK, TN), lambda i, j, k: (k, j)),
                pl.BlockSpec((1, TN), lambda i, j, k: (0, j)),
            ],
            out_specs=pl.BlockSpec((TM, TN), lambda i, j, k: (i, j)),
            scratch_shapes=[pltpu.VMEM((TM, TN), jnp.float32)],
        ),
        out_shape=jax.ShapeDtypeStruct((Mp, Np), out_dtype),
        compiler_params=pltpu.CompilerParams(
            dimension_semantics=("parallel", "parallel", "arbitrary")),
    )(a_p, b_p, bias_p)
    return out[:M, :N]


# --------------------------------------------------------------------------------------
# Fused InstanceNorm (+ optional cond affine, + optional residual, + optional relu)
# operating on [N, HW, C] (stats over HW sublane axis, channels on lanes)
# --------------------------------------------------------------------------------------

def _inorm_kernel(*refs, has_affine, has_res, relu):
    x_ref = refs[0]
    idx = 1
    g_ref = b_ref = r_ref = None
    if has_affine:
        g_ref, b_ref = refs[idx], refs[idx + 1]
        idx += 2
    if has_res:
        r_ref = refs[idx]
        idx += 1
    o_ref = refs[idx]

    x = x_ref[...].astype(jnp.float32)                       # [N, HW, C]
    mean = jnp.mean(x, axis=1, keepdims=True)
    var = jnp.mean(jnp.square(x - mean), axis=1, keepdims=True)
    y = (x - mean) * lax.rsqrt(var + IN_EPS)
    if has_affine:
        y = y * g_ref[...].astype(jnp.float32) + b_ref[...].astype(jnp.float32)
    if has_res:
        y = y + r_ref[...].astype(jnp.float32)
    if relu:
        y = jnp.maximum(y, 0.0)
    o_ref[...] = y.astype(o_ref.dtype)


def instance_norm_nhwc(x, gamma=None, beta=None, residual=None, relu=False, out_dtype=None):
    """x: [N, HW, C]; per-(n,c) instance norm over HW; optional gamma/beta [N,C], residual, relu."""
    N, HW, C = x.shape
    out_dtype = out_dtype or x.dtype
    has_affine = gamma is not None
    has_res = residual is not None

    inputs = [x]
    in_specs = [pl.BlockSpec((N, HW, C), lambda i: (0, 0, 0))]
    if has_affine:
        inputs.append(gamma.reshape(N, 1, C).astype(jnp.float32))
        inputs.append(beta.reshape(N, 1, C).astype(jnp.float32))
        in_specs.append(pl.BlockSpec((N, 1, C), lambda i: (0, 0, 0)))
        in_specs.append(pl.BlockSpec((N, 1, C), lambda i: (0, 0, 0)))
    if has_res:
        inputs.append(residual)
        in_specs.append(pl.BlockSpec((N, HW, C), lambda i: (0, 0, 0)))

    return pl.pallas_call(
        functools.partial(_inorm_kernel, has_affine=has_affine, has_res=has_res, relu=relu),
        grid=(1,),
        in_specs=in_specs,
        out_specs=pl.BlockSpec((N, HW, C), lambda i: (0, 0, 0)),
        out_shape=jax.ShapeDtypeStruct((N, HW, C), out_dtype),
    )(*inputs)


# --------------------------------------------------------------------------------------
# Pooling / softmax kernels
# --------------------------------------------------------------------------------------

def _tap_max_kernel(x_ref, o_ref):
    o_ref[...] = jnp.max(x_ref[...].astype(jnp.float32), axis=0,
                         keepdims=True).astype(o_ref.dtype)


def _mean_hw_kernel(x_ref, o_ref):
    o_ref[...] = jnp.mean(x_ref[...].astype(jnp.float32), axis=1,
                          keepdims=True).astype(o_ref.dtype)


def _softmax_kernel(x_ref, o_ref):
    x = x_ref[...].astype(jnp.float32)
    m = jnp.max(x, axis=-1, keepdims=True)
    e = jnp.exp(x - m)
    o_ref[...] = (e / jnp.sum(e, axis=-1, keepdims=True)).astype(o_ref.dtype)


def softmax_rows(x2d):
    R, L = x2d.shape
    return pl.pallas_call(
        _softmax_kernel,
        grid=(1,),
        in_specs=[pl.BlockSpec((R, L), lambda i: (0, 0))],
        out_specs=pl.BlockSpec((R, L), lambda i: (0, 0)),
        out_shape=jax.ShapeDtypeStruct((R, L), jnp.float32),
    )(x2d.astype(jnp.float32))


# --------------------------------------------------------------------------------------
# Glue (layout only): im2col / conv / pool wrappers — compute stays in Pallas
# --------------------------------------------------------------------------------------

def _extract_patches_nhwc(x, kh, kw, stride, pad, pad_value=0.0):
    """x: [N,H,W,C] -> patches [N, OH, OW, kh*kw, C]."""
    N, H, W, C = x.shape
    xp = jnp.pad(x, ((0, 0), (pad, pad), (pad, pad), (0, 0)), constant_values=pad_value)
    OH = (H + 2 * pad - kh) // stride + 1
    OW = (W + 2 * pad - kw) // stride + 1
    taps = []
    for i in range(kh):
        for j in range(kw):
            taps.append(xp[:, i:i + stride * (OH - 1) + 1:stride,
                              j:j + stride * (OW - 1) + 1:stride, :])
    pat = jnp.stack(taps, axis=3)                 # [N, OH, OW, kh*kw, C]
    return pat, OH, OW


def conv2d_nhwc(x_flat, H, W, w, bias=None, stride=1, pad=0, act="none",
                out_dtype=jnp.bfloat16):
    """x_flat: [N, H*W, C]; w: torch layout (OC, IC, KH, KW). Returns ([N, OH*OW, OC], OH, OW)."""
    N, HW, C = x_flat.shape
    OC, IC, KH, KW = w.shape
    assert IC == C
    x = x_flat.reshape(N, H, W, C)
    pat, OH, OW = _extract_patches_nhwc(x, KH, KW, stride, pad, 0.0)
    a = pat.reshape(N * OH * OW, KH * KW * C)
    wm = w.transpose(2, 3, 1, 0).reshape(KH * KW * IC, OC)   # rows match (tap, channel) order
    out = matmul(a, wm, bias, act=act, out_dtype=out_dtype)  # [N*OH*OW, OC]
    return out.reshape(N, OH * OW, OC), OH, OW


def maxpool2d_nhwc(x_flat, H, W, k=3, stride=2, pad=1):
    N, HW, C = x_flat.shape
    x = x_flat.reshape(N, H, W, C)
    pat_shifts = []
    xp = jnp.pad(x, ((0, 0), (pad, pad), (pad, pad), (0, 0)), constant_values=-jnp.inf)
    OH = (H + 2 * pad - k) // stride + 1
    OW = (W + 2 * pad - k) // stride + 1
    for i in range(k):
        for j in range(k):
            pat_shifts.append(
                xp[:, i:i + stride * (OH - 1) + 1:stride,
                      j:j + stride * (OW - 1) + 1:stride, :].reshape(-1))
    st = jnp.stack(pat_shifts, axis=0)            # [k*k, N*OH*OW*C]  (lane-dense)
    L = st.shape[1]
    out = pl.pallas_call(
        _tap_max_kernel,
        grid=(1,),
        in_specs=[pl.BlockSpec((k * k, L), lambda i: (0, 0))],
        out_specs=pl.BlockSpec((1, L), lambda i: (0, 0)),
        out_shape=jax.ShapeDtypeStruct((1, L), x_flat.dtype),
    )(st)
    return out.reshape(N, OH * OW, C), OH, OW


def adaptive_avgpool_nhwc(x_flat):
    N, HW, C = x_flat.shape
    out = pl.pallas_call(
        _mean_hw_kernel,
        grid=(1,),
        in_specs=[pl.BlockSpec((N, HW, C), lambda i: (0, 0, 0))],
        out_specs=pl.BlockSpec((N, 1, C), lambda i: (0, 0, 0)),
        out_shape=jax.ShapeDtypeStruct((N, 1, C), jnp.float32),
    )(x_flat)
    return out                                    # [N, 1, C]


def upsample2x_nhwc(x_flat, H, W):
    # TODO(synk): fuse the nearest-neighbour upsample into the following conv's patch gather.
    N, HW, C = x_flat.shape
    x = x_flat.reshape(N, H, W, C)
    x = jnp.repeat(jnp.repeat(x, 2, axis=1), 2, axis=2)
    return x.reshape(N, 4 * H * W, C), 2 * H, 2 * W


# --------------------------------------------------------------------------------------
# Parameter init (deterministic, synthetic)
# --------------------------------------------------------------------------------------

def _w(key, shape, scale=0.05):
    return scale * jax.random.normal(key, shape, jnp.float32)


def init_resnet_encoder(key, base, z_dim):
    keys = iter(jax.random.split(key, 64))
    p = {"conv1_w": _w(next(keys), (base, 3, 7, 7))}
    plan = [(base, base, 1), (base, 2 * base, 2), (2 * base, 4 * base, 2), (4 * base, 8 * base, 2)]
    layers = []
    for (cin, cout, stride) in plan:
        blocks = []
        for b in range(2):                         # resnet18: 2 BasicBlocks per layer
            bi = cin if b == 0 else cout
            bs = stride if b == 0 else 1
            blk = {"conv1_w": _w(next(keys), (cout, bi, 3, 3)),
                   "conv2_w": _w(next(keys), (cout, cout, 3, 3)),
                   "stride": bs}
            if bs != 1 or bi != cout:
                blk["down_w"] = _w(next(keys), (cout, bi, 1, 1))
            blocks.append(blk)
        layers.append(blocks)
    p["layers"] = layers
    # DenseEncoderLayer: Conv2d(num_channels_pre_fc, 2*z_dim, kernel_size=spatial_size(=1), bias=True)
    p["fc_w"] = _w(next(keys), (2 * z_dim, 8 * base, 1, 1))
    p["fc_b"] = jnp.zeros((2 * z_dim,), jnp.float32)
    return p


def init_classup(key, z_dim, hidden, out_dim, depth=2):
    keys = jax.random.split(key, depth + 2)
    dims = [z_dim] + [hidden] * (depth + 1) + [out_dim]
    return [{"w": _w(k, (dims[i], dims[i + 1])),
             "b": jnp.zeros((dims[i + 1],), jnp.float32)}
            for i, k in enumerate(keys)]


def init_generator(key, z_dim, emb_dim, img_size, ch0=64, base_spatial=4):
    n_up = int(round(math.log2(img_size // base_spatial)))
    keys = iter(jax.random.split(key, 4 + 3 * n_up))
    cond_dim = z_dim + emb_dim
    p = {"fc_w": _w(next(keys), (z_dim, ch0 * base_spatial * base_spatial)),
         "fc_b": jnp.zeros((ch0 * base_spatial * base_spatial,), jnp.float32),
         "ch0": ch0, "base_spatial": base_spatial, "blocks": []}
    c_in = ch0
    for i in range(n_up):
        c_out = max(ch0 // (2 ** (i + 1)), 16)
        p["blocks"].append({
            "cond_w": _w(next(keys), (cond_dim, 2 * c_in)),
            "cond_b": jnp.zeros((2 * c_in,), jnp.float32),
            "conv_w": _w(next(keys), (c_out, c_in, 3, 3)),
            "conv_b": jnp.zeros((c_out,), jnp.float32)})
        c_in = c_out
    p["out_w"] = _w(next(keys), (3, c_in, 3, 3))
    p["out_b"] = jnp.zeros((3,), jnp.float32)
    return p


# --------------------------------------------------------------------------------------
# Forward passes
# --------------------------------------------------------------------------------------

def basic_block_nhwc(x, H, W, blk):
    stride = blk["stride"]
    out, OH, OW = conv2d_nhwc(x, H, W, blk["conv1_w"], None, stride=stride, pad=1)
    out = instance_norm_nhwc(out, relu=True)
    out, _, _ = conv2d_nhwc(out, OH, OW, blk["conv2_w"], None, stride=1, pad=1)
    if "down_w" in blk:
        identity, _, _ = conv2d_nhwc(x, H, W, blk["down_w"], None, stride=stride, pad=0)
        identity = instance_norm_nhwc(identity, relu=False)
    else:
        identity = x
    # fused: IN(out) + identity, then relu (matches relu(IN(conv2(.)) + identity))
    out = instance_norm_nhwc(out, residual=identity, relu=True)
    return out, OH, OW


def resnet_encoder_forward(p, x_nchw):
    N = x_nchw.shape[0]
    x = jnp.transpose(x_nchw, (0, 2, 3, 1)).astype(jnp.bfloat16)   # NHWC, bf16 activations
    H, W, C = x.shape[1], x.shape[2], x.shape[3]
    h = x.reshape(N, H * W, C)

    h, H, W = conv2d_nhwc(h, H, W, p["conv1_w"], None, stride=2, pad=3)   # conv1 (bias=False)
    h = instance_norm_nhwc(h, relu=True)                                   # bn1 ('in') + relu
    h, H, W = maxpool2d_nhwc(h, H, W, 3, 2, 1)                             # maxpool
    for blocks in p["layers"]:                                             # layer1..layer4
        for blk in blocks:
            h, H, W = basic_block_nhwc(h, H, W, blk)
    pooled = adaptive_avgpool_nhwc(h)                                      # avgpool -> [N,1,C]
    feat = pooled.reshape(N, -1)
    c_pre = feat.shape[1]
    wm = p["fc_w"].reshape(p["fc_w"].shape[0], c_pre).T                    # DenseEncoderLayer (1x1)
    enc = matmul(feat, wm, p["fc_b"], out_dtype=jnp.float32)               # [N, 2*z_dim]
    return enc


class DiagonalGaussianDistribution:
    def __init__(self, parameters, deterministic=False):
        z2 = parameters.shape[1]
        self.mean = parameters[:, : z2 // 2]
        self.logvar = jnp.clip(parameters[:, z2 // 2:], -30.0, 20.0)
        self.deterministic = deterministic

    def mode(self):
        return self.mean


def classup_forward(layers, x):
    # x: [N, z_dim]  (already squeezed)
    for i, lyr in enumerate(layers):
        act = "leaky_relu" if i < len(layers) - 1 else "none"
        x = matmul(x, lyr["w"], lyr["b"], act=act, out_dtype=jnp.float32)
    return softmax_rows(x)                                  # softmax over dim 1


def generator_forward(p, z, emb):
    N = z.shape[0]
    cond = jnp.concatenate([z, emb], axis=1)
    s = p["base_spatial"]
    ch0 = p["ch0"]
    h = matmul(z, p["fc_w"], p["fc_b"], out_dtype=jnp.bfloat16)            # [N, ch0*s*s]
    h = h.reshape(N, ch0, s, s).transpose(0, 2, 3, 1).reshape(N, s * s, ch0)
    H = W = s
    for blk in p["blocks"]:
        c_in = blk["conv_w"].shape[1]
        gb = matmul(cond, blk["cond_w"], blk["cond_b"], out_dtype=jnp.float32)   # [N, 2*c_in]
        gamma, beta = gb[:, :c_in], gb[:, c_in:]
        h = instance_norm_nhwc(h, gamma=1.0 + gamma, beta=beta, relu=True)       # cond IN + relu
        h, H, W = upsample2x_nhwc(h, H, W)
        h, H, W = conv2d_nhwc(h, H, W, blk["conv_w"], blk["conv_b"], stride=1, pad=1)
    h = instance_norm_nhwc(h, relu=True)
    img, H, W = conv2d_nhwc(h, H, W, p["out_w"], p["out_b"], stride=1, pad=1,
                            act="tanh", out_dtype=jnp.float32)
    img = img.reshape(N, H, W, 3).transpose(0, 3, 1, 2)                    # back to NCHW
    return img


def bigae_forward(params, x, config):
    # encode
    enc = resnet_encoder_forward(params["encoder"], x)                     # [N, 2*z_dim]
    h4 = enc.reshape(enc.shape[0], -1, 1, 1)
    dist = DiagonalGaussianDistribution(h4, deterministic=config["deterministic"])
    mode = dist.mode()                                                     # [N, z_dim, 1, 1]
    # decode(p.mode()): squeeze(-1).squeeze(-1) -> [N, z_dim]
    z = mode.reshape(mode.shape[0], -1)
    emb = classup_forward(params["classup"], z)                            # ClassUp -> softmax
    img = generator_forward(params["generator"], z, emb)                   # BigGAN-style decoder
    return img, mode, dist


# --------------------------------------------------------------------------------------

if __name__ == "__main__":
    config = {
        "z_dim": 32,
        "in_size": 64,
        "deterministic": True,
        "pre_process": False,
        "use_actnorm_in_dec": False,
        "pretrained": False,
        "encoder_type": "resnet18",
        "norm": "in",
    }
    BASE = 16        # scaled-down resnet18 width (real: 64)
    EMB_DIM = 128    # scaled-down class_embedding_dim (real: 1000)

    key = jax.random.PRNGKey(0)
    k_enc, k_cls, k_gen, k_x = jax.random.split(key, 4)

    params = {
        "encoder": init_resnet_encoder(k_enc, BASE, config["z_dim"]),
        "classup": init_classup(k_cls, config["z_dim"], hidden=2 * EMB_DIM,
                                out_dim=EMB_DIM, depth=2),
        "generator": init_generator(k_gen, config["z_dim"], EMB_DIM, config["in_size"]),
    }

    x = jax.random.normal(k_x, (2, 3, config["in_size"], config["in_size"]), jnp.float32)

    img, mode, dist = bigae_forward(params, x, config)
    jax.block_until_ready((img, mode, dist.mean, dist.logvar))

    assert img.shape == (2, 3, config["in_size"], config["in_size"])
    assert mode.shape == (2, config["z_dim"], 1, 1)
    assert dist.logvar.shape == (2, config["z_dim"], 1, 1)
    assert bool(jnp.all(jnp.isfinite(img)))

    print("KERNEL_OK")
</pallas_src>

<mosaic_0001>
module attributes {stable_mosaic.version = 11 : i64} {
  func.func @_matmul_kernel(%arg0: i32, %arg1: i32, %arg2: i32, %arg3: memref<256x256xbf16, #tpu.memory_space<vmem>>, %arg4: memref<256x128xbf16, #tpu.memory_space<vmem>>, %arg5: memref<1x128xf32, #tpu.memory_space<vmem>>, %arg6: memref<256x128xbf16, #tpu.memory_space<vmem>>, %arg7: memref<256x128xf32, #tpu.memory_space<vmem>>) attributes {dimension_semantics = [#tpu.dimension_semantics<parallel>, #tpu.dimension_semantics<parallel>, #tpu.dimension_semantics<arbitrary>], iteration_bounds = array<i64: 8, 1, 1>, scalar_prefetch = 0 : i64, scratch_operands = 1 : i64, tpu.core_type = #tpu.core_type<tc>, window_params = [{transform_indices = @transform_0, window_bounds = array<i64: 256, 256>}, {transform_indices = @transform_1, window_bounds = array<i64: 256, 128>}, {transform_indices = @transform_2, window_bounds = array<i64: 1, 128>}, {transform_indices = @transform_3, window_bounds = array<i64: 256, 128>}]} {
    %c0_i32 = arith.constant 0 : i32
    %0 = arith.cmpi eq, %arg2, %c0_i32 : i32
    %1 = arith.extui %0 : i1 to i32
    %c0_i32_0 = arith.constant 0 : i32
    %2 = arith.cmpi ne, %1, %c0_i32_0 : i32
    scf.if %2 {
      %cst_10 = arith.constant 0.000000e+00 : f32
      %12 = vector.broadcast %cst_10 : f32 to vector<256x128xf32>
      %c0_11 = arith.constant 0 : index
      %c0_12 = arith.constant 0 : index
      %13 = vector.load %arg7[%c0_11, %c0_12] : memref<256x128xf32, #tpu.memory_space<vmem>>, vector<256x128xf32>
      tpu.vector_store %arg7[%c0_11, %c0_12], %12 {strides = array<i32>} : memref<256x128xf32, #tpu.memory_space<vmem>>, vector<256x128xf32>,
    } else {
    }
    %c0 = arith.constant 0 : index
    %c0_1 = arith.constant 0 : index
    %3 = vector.load %arg7[%c0, %c0_1] : memref<256x128xf32, #tpu.memory_space<vmem>>, vector<256x128xf32>
    %c0_2 = arith.constant 0 : index
    %c0_3 = arith.constant 0 : index
    %4 = vector.load %arg3[%c0_2, %c0_3] : memref<256x256xbf16, #tpu.memory_space<vmem>>, vector<256x256xbf16>
    %c0_4 = arith.constant 0 : index
    %c0_5 = arith.constant 0 : index
    %5 = vector.load %arg4[%c0_4, %c0_5] : memref<256x128xbf16, #tpu.memory_space<vmem>>, vector<256x128xbf16>
    %cst = arith.constant dense<0.000000e+00> : vector<256x128xf32>
    %6 = tpu.matmul %4, %5, %cst {dimension_numbers = #tpu.dot_dimension_numbers<[1], [0], [0], [1], [0, 0, 1, 1], [], []>} : vector<256x256xbf16>, vector<256x128xbf16>, vector<256x128xf32> -> vector<256x128xf32>
    %7 = arith.addf %3, %6 : vector<256x128xf32>
    %c0_6 = arith.constant 0 : index
    %c0_7 = arith.constant 0 : index
    %8 = vector.load %arg7[%c0_6, %c0_7] : memref<256x128xf32, #tpu.memory_space<vmem>>, vector<256x128xf32>
    tpu.vector_store %arg7[%c0_6, %c0_7], %7 {strides = array<i32>} : memref<256x128xf32, #tpu.memory_space<vmem>>, vector<256x128xf32>,
    %c0_i32_8 = arith.constant 0 : i32
    %9 = arith.cmpi eq, %arg2, %c0_i32_8 : i32
    %10 = arith.extui %9 : i1 to i32
    %c0_i32_9 = arith.constant 0 : i32
    %11 = arith.cmpi ne, %10, %c0_i32_9 : i32
    scf.if %11 {
      %c0_10 = arith.constant 0 : index
      %c0_11 = arith.constant 0 : index
      %12 = vector.load %arg7[%c0_10, %c0_11] : memref<256x128xf32, #tpu.memory_space<vmem>>, vector<256x128xf32>
      %c0_12 = arith.constant 0 : index
      %c0_13 = arith.constant 0 : index
      %13 = vector.load %arg5[%c0_12, %c0_13] : memref<1x128xf32, #tpu.memory_space<vmem>>, vector<1x128xf32>
      %14 = vector.broadcast %13 : vector<1x128xf32> to vector<256x128xf32>
      %15 = arith.addf %12, %14 : vector<256x128xf32>
      %16 = arith.truncf %15 : vector<256x128xf32> to vector<256x128xbf16>
      %c0_14 = arith.constant 0 : index
      %c0_15 = arith.constant 0 : index
      %17 = vector.load %arg6[%c0_14, %c0_15] : memref<256x128xbf16, #tpu.memory_space<vmem>>, vector<256x128xbf16>
      tpu.vector_store %arg6[%c0_14, %c0_15], %16 {strides = array<i32>} : memref<256x128xbf16, #tpu.memory_space<vmem>>, vector<256x128xbf16>,
    } else {
    }
    return
  }
  func.func @transform_0(%arg0: i32, %arg1: i32, %arg2: i32) -> (i32, i32) {
    %c0_i32 = arith.constant 0 : i32
    return %arg0, %arg2 : i32, i32
  }
  func.func @transform_1(%arg0: i32, %arg1: i32, %arg2: i32) -> (i32, i32) {
    %c0_i32 = arith.constant 0 : i32
    return %arg2, %arg1 : i32, i32
  }
  func.func @transform_2(%arg0: i32, %arg1: i32, %arg2: i32) -> (i32, i32) {
    %c0_i32 = arith.constant 0 : i32
    %c0_i32_0 = arith.constant 0 : i32
    return %c0_i32, %arg1 : i32, i32
  }
  func.func @transform_3(%arg0: i32, %arg1: i32, %arg2: i32) -> (i32, i32) {
    %c0_i32 = arith.constant 0 : i32
    return %arg0, %arg1 : i32, i32
  }
}

</mosaic_0001>

<bundles_post_ra>
// kernel: tpu_custom_call.1
= control target key start
LH: loop header
LB: loop body
LE: loop exit
PB: predicated region body
PF: predicated region fallthrough
CT: control target
= control target key end

     0   :  { %8 = vsyncpa [#allocation4], 0  ;;  %s2221_s0 = inlined_call_operand.hbm [shape: bf16[2048,256], index: 0, kind: input, shape index: {}]   ;;  %s2222_s1 = inlined_call_operand.hbm [shape: bf16[256,128], index: 1, kind: input, shape index: {}]   ;;  %s2223_s2 = inlined_call_operand.vmem [shape: f32[1,128], index: 2, kind: input, shape index: {}]   ;;  %s2224_s3 = inlined_call_operand.hbm [shape: bf16[2048,128], index: 3, kind: output, shape index: {}]  }
   0x1   :  { %10 = vsyncpa [#allocation4 + $0x1], 0 }
   0x2   :  { %11 = vsyncpa [#allocation7], 0 }
   0x3   :  { %12 = vsyncpa [#allocation5], 0 }
   0x4   :  { %14 = vsyncpa [#allocation5 + $0x1], 0  ;;  %s1913_s12 = smov 0   ;;  %s1915_s13 = smov 0  }
   0x5   :  { %s1917_s14 = smov 0   ;;  %s1919_s15 = smov 0  }
   0x6   :  { %s1921_s16 = smov 0   ;;  %s1923_s17 = smov 0  }
   0x7 LB: > { %s1237_s18 = sadd.s32 4294967295, %s1882_s17   ;;  %s1238_s19 = sadd.s32 4294967294, %s1882_s17   ;;  %s1882_s17 = sphi %s1923_s17, %s20_s17   ;;  %s1878_s16 = sphi %s1921_s16, %s2247_s16   ;;  %s1874_s15 = sphi %s1919_s15, %s2246_s15   ;;  %s1870_s14 = sphi %s1917_s14, %s2245_s14   ;;  %s1866_s13 = sphi %s1915_s13, %s2244_s13   ;;  %s1862_s12 = sphi %s1913_s12, %s2243_s12  }
   0x8   : > { %p61_p0 = scmp.ne.s32.totalorder %s1866_s13, %s1862_s12  ;;  %p1947_p1 = scmp.eq.s32.totalorder %s1237_s18, 0 }
   0x9   : > { %p1951_p2 = scmp.eq.s32.totalorder %s1237_s18, 7  ;;  %p147_p3 = scmp.eq.s32.totalorder %s1238_s19, 7 }
   0xa   : > { %s2229_s20 = scalar_select %p1947_p1, 1, 0 }
   0xb   : > { %s2230_s21 = scalar_select %p1951_p2, 1, 0 }
   0xc   : > { %p1957_p4 = por %p1947_p1, %p61_p0  ;;  %p1239_p5 = scmp.ge.s32.totalorder %s1882_s17, 1 }
   0xd   : > { %p1962_p6 = por %p147_p3, %p61_p0  ;;  %p154_p7 = scmp.lt.s32.totalorder %s1882_s17, 9 }
   0xe   : > { %s2231_s22 = scalar_select %p1957_p4, 1, 0 }
   0xf   : > { %s2232_s23 = scalar_select %p1962_p6, 1, 0 }
  0x10   : > { %p1967_p8 = pnand %p1239_p5, %p154_p7  ;;  %s1884_s25 = smov [#allocation6]  }
  0x11   : > { %s170_s26 = sshll.u32 %s1884_s25, 4  ;;  %s39_s28 = sadd.s32 1, %s1878_s16  ;;  %s171_s26 = int_to_ptr.vmem [resolvable:$true] %s170_s26 }
  0x12   : > { %s2233_s24 = scalar_select %p1967_p8, 1, 0 }
  0x13   : > { %p1603_p9 = pneg %p1967_p8  ;;  %s1738_s4 = scalar_lea.hbm %s2222_s1, 2048 }
  0x14   : > { %p1739_p11 = scmp.ne.s32.totalorder %s2222_s1, %s1738_s4  ;;  %p1745_p3 = scmp.lt.u32.totalorder %s1738_s4, %s2222_s1 }
  0x15   : > { %p1975_p10 = pnand %p1603_p9, %p1947_p1 }
  0x17   : > { %p1740_p12 = pneg %p1975_p10 }
  0x19   : > { %p1741_p13 = pnand %p1740_p12, %p1739_p11 }
  0x1b   : > { %p1742_p0 = pneg %p1741_p13 }
  0x1d   : > { %p1747_p5 = pnand %p1745_p3, %p1742_p0 }
  0x1f   : > { %1750 = shalt.err (!%p1747_p5)
}
  0x20   : > { %s1751_s9 = scalar_lea.vmem %s171_s26, 2048  ;;  %p1759_p1 = scmp.lt.s32.totalorder %s171_s26, %s171_s26 }
  0x21   : > { %p1752_p7 = scmp.ne.s32.totalorder %s171_s26, %s1751_s9  ;;  %p1760_p4 = scmp.lt.s32.totalorder %s1751_s9, %s1751_s9 }
  0x23   : > { %p1754_p9 = pnand %p1752_p7, %p1740_p12  ;;  %p1761_p8 = por %p1760_p4, %p1759_p1 }
  0x25   : > { %p1755_p6 = pneg %p1754_p9 }
  0x27   : > { %p1762_p2 = pnand %p1761_p8, %p1755_p6 }
  0x29   : > { %1765 = shalt.err (!%p1762_p2)
}
  0x2a   : > { %s1885_s10 = smov 64   ;;  %s1886_s11 = smov 4  }
  0x2b   : > { %1606 = dma.hbm_to_vmem [thread:$0]  (!%p1975_p10), %s2222_s1, 2048, %s171_s26, [#allocation7], %s1885_s10, %s1885_s10, %s1886_s11  }
  0x2c   : > { %p41_p1 = scmp.ge.s32.totalorder %s39_s28, 8  ;;  %s48_s25 = sadd.s32 1, %s1870_s14 }
  0x2d   : > { %p55_p2 = scmp.ne.s32.totalorder %s1870_s14, %s1866_s13  ;;  %p56_p4 = scmp.eq.s32.totalorder %s1882_s17, 0 }
  0x2e   : > { %s2249_s28 = smov (%p41_p1, %s39_s28), 0  ;;  %p2236_p8 = scmp.ne.s32.totalorder %s2230_s21, 0 }
  0x2f   : > { %p2002_p6 = por %p56_p4, %p55_p2  ;;  %s43_s27 = ssub.s32 %s1878_s16, %s2249_s28 }
  0x30   : > { %p2008_p11 = por %p2236_p8, %p55_p2  ;;  %p1616_p12 = scmp.lt.s32.totalorder %s1882_s17, 8 }
  0x31   : > { %p46_p10 = scmp.eq.s32.totalorder %s43_s27, 0  ;;  %s190_s26 = sand.u32 1, %s1870_s14  }
  0x32   : > { %s1243_s4 = sshll.u32 %s190_s26, 8  ;;  %s1338_s6 = sshll.u32 %s1878_s16, 12 }
  0x33   : > { %s2017_s5 = scalar_select %p46_p10, %s1870_s14, %s48_s25  }
  0x34   : > { %s2023_s9 = scalar_lea.hbm %s2221_s0, %s1338_s6  ;;  %s194_s21 = scalar_lea.vmem [#allocation3], %s1243_s4 }
  0x35   : > { %s204_s10 = sshll.u32 %s194_s21, 4  ;;  %p2029_p13 = pnand %p1616_p12, %p2002_p6  ;;  %s2025_s10 = int_to_ptr.vmem [resolvable:$true] %s204_s10 }
  0x36   : > { %s2033_s18 = scalar_lea.sflag [#allocation4], %s190_s26  ;;  %s1766_s19 = scalar_lea.hbm %s2023_s9, 4096 }
  0x37   : > { %p1767_p0 = scmp.ne.s32.totalorder %s2023_s9, %s1766_s19  ;;  %p1768_p3 = pneg %p2029_p13 }
  0x38   : > { %s1771_s29 = scalar_lea.hbm %s2221_s0, 32768  ;;  %p1772_p9 = scmp.lt.u32.totalorder %s2023_s9, %s2221_s0 }
  0x39   : > { %p1769_p5 = pnand %p1768_p3, %p1767_p0  ;;  %p1773_p1 = scmp.lt.u32.totalorder %s1771_s29, %s1766_s19 }
  0x3a   : > { %p1775_p4 = scmp.lt.u32.totalorder %s1766_s19, %s2023_s9 }
  0x3b   : > { %p1770_p7 = pneg %p1769_p5  ;;  %p1774_p2 = por %p1773_p1, %p1772_p9 }
  0x3d   : > { %p1776_p6 = por %p1775_p4, %p1774_p2 }
  0x3f   : > { %p1777_p8 = pnand %p1776_p6, %p1770_p7 }
  0x41   : > { %1780 = shalt.err (!%p1777_p8)
}
  0x42   : > { %s1781_s26 = scalar_lea.vmem %s2025_s10, 4096  ;;  %s1887_s7 = smov [#allocation3]  }
  0x43   : > { %p1782_p12 = scmp.ne.s32.totalorder %s2025_s10, %s1781_s26  ;;  %s1786_s8 = sshll.u32 %s1887_s7, 4  ;;  %s1787_s8 = int_to_ptr.vmem [resolvable:$false] %s1786_s8 }
  0x44   : > { %s1788_s21 = scalar_lea.vmem %s1787_s8, 8192  ;;  %p1789_p5 = scmp.lt.s32.totalorder %s2025_s10, %s1787_s8 }
  0x45   : > { %p1784_p10 = pnand %p1782_p12, %p1768_p3  ;;  %p1790_p9 = scmp.lt.s32.totalorder %s1788_s21, %s1781_s26 }
  0x47   : > { %p1785_p0 = pneg %p1784_p10  ;;  %p1791_p1 = por %p1790_p9, %p1789_p5 }
  0x49   : > { %p1792_p2 = pnand %p1791_p1, %p1785_p0 }
  0x4b   : > { %1795 = shalt.err (!%p1792_p2)
}
  0x4c   : > { %s1888_s19 = smov 128   ;;  %s1889_s25 = smov 8  }
  0x4d   : > { %1610 = dma.hbm_to_vmem [thread:$0]  (!%p2029_p13), %s2023_s9, 4096, %s2025_s10, %s2033_s18, %s1888_s19, %s1888_s19, %s1889_s25  }
  0x4e   : > { %p2239_p3 = scmp.ne.s32.totalorder %s2233_s24, 0 }
  0x4f   : > { %s2064_s27 = sand.u32 (!%p2239_p3), 1, %s1866_s13   ;;  %p2240_p7 = scmp.ne.s32.totalorder (!%p2239_p3), %s2231_s22, 0 }
  0x50   : > { %216 = sbr.rel (%p2239_p3) target bundleno = 416 (0x1a0), region = 32  ;;  %s1248_s29 = sshll.u32 (!%p2239_p3), %s2064_s27, 8 }
  0x51   : > { %s219_s4 = scalar_lea.sflag (!%p2239_p3), [#allocation4], %s2064_s27  ;;  %s2068_s6 = scalar_lea.vmem (!%p2239_p3), [#allocation3], %s1248_s29 }
  0x57   : > { %1849 = dma.done.wait (%p2240_p7), %s219_s4, 4096  }
  0x58   : > { %1851 = vsyncadd (%p2240_p7), %s219_s4, 4294963200  ;;  %p2241_p13 = scmp.ne.s32.totalorder %s2229_s20, 0 }
  0x5a   : > { %1853 = dma.done.wait (%p2241_p13), [#allocation7], 2048  }
  0x5b   : > { %1855 = vsyncadd (%p2241_p13), [#allocation7], 4294965248  ;;  %v1674_v0 = vld [vmem:[#allocation6 + $0x40] sm:$0xff]   ;;  %v1676_v2 = vld [vmem:[#allocation6 + $0x48] sm:$0xff]   ;;  %s1250_s24 = sshll.u32 %s2064_s27, 7  ;;  %s1371_s10 = sshll.u32 %s1874_s15, 11 }
  0x5c   : > { %v1675_v1 = vld [vmem:[#allocation6] sm:$0xff]   ;;  %1467 = vmatprep.subr.bf16.mxu0 %v1674_v0  ;;  %1579 = vmatprep.subr.bf16.mxu1 %v1674_v0  ;;  %v1677_v3 = vld [vmem:[#allocation6 + $0x8] sm:$0xff]   ;;  %v1678_v4 = vld [vmem:[#allocation6 + $0x50] sm:$0xff]   ;;  %s2120_s9 = scalar_lea.vmem [#allocation8], %s1250_s24  ;;  %s2169_s7 = scalar_lea.hbm %s2224_s3, %s1371_s10 }
  0x5d   : > { %1468 = vmatpush3.bf16.msra.mxu0 %v1675_v1  ;;  %1587 = vmatpush3.bf16.msra.mxu1 %v1675_v1  ;;  %v1679_v5 = vld [vmem:[#allocation6 + $0x10] sm:$0xff]   ;;  %v1680_v6 = vld [vmem:[#allocation6 + $0x58] sm:$0xff]   ;;  %v1682_v8 = vld [vmem:[#allocation6 + $0x60] sm:$0xff]   ;;  %s1122_s11 = sshll.u32 %s2120_s9, 4  ;;  %s1108_s15 = scalar_lea.sflag [#allocation5], %s2064_s27  ;;  %s2171_s11 = int_to_ptr.vmem [resolvable:$true] %s1122_s11 }
  0x5e   : > { %1469 = vmatprep.subr.bf16.mxu0 %v1676_v2  ;;  %1580 = vmatprep.subr.bf16.mxu1 %v1676_v2  ;;  %v1681_v7 = vld [vmem:[#allocation6 + $0x18] sm:$0xff]   ;;  %v1683_v9 = vld [vmem:[#allocation6 + $0x20] sm:$0xff]   ;;  %v1684_v10 = vld [vmem:[#allocation6 + $0x68] sm:$0xff]   ;;  %s1796_s8 = scalar_lea.vmem %s2171_s11, 2048  ;;  %s1890_s21 = smov [#allocation8]  }
  0x5f   : > { %v1692_v11 = vld [vmem:[%s2068_s6 + $0x4] ss:$8 sps:$4 sm:$0xff]   ;;  %v1686_v14 = vld [vmem:[#allocation6 + $0x70] sm:$0xff]   ;;  %v1688_v16 = vld [vmem:[#allocation6 + $0x78] sm:$0xff]   ;;  %p1797_p4 = scmp.ne.s32.totalorder %s2171_s11, %s1796_s8  ;;  %s1800_s19 = sshll.u32 %s1890_s21, 4  ;;  %s1801_s19 = int_to_ptr.vmem [resolvable:$false] %s1800_s19 }
  0x60   : > { %v1695_v12 = vld [vmem:[%s2068_s6 + $0x84] ss:$8 sps:$4 sm:$0xff]   ;;  %680 = vmatprep.mubr.bf16.mxu0 %v1692_v11  ;;  %v1687_v15 = vld [vmem:[#allocation6 + $0x30] sm:$0xff]   ;;  %v1689_v17 = vld [vmem:[#allocation6 + $0x38] sm:$0xff]   ;;  %s1802_s25 = scalar_lea.vmem %s1801_s19, 4096  ;;  %p1803_p12 = scmp.lt.s32.totalorder %s2171_s11, %s1801_s19 }
  0x61   : > { %1470 = vmatpush3.bf16.msra.mxu0 %v1677_v3  ;;  %1588 = vmatpush3.bf16.msra.mxu1 %v1677_v3  ;;  %v1685_v13 = vld [vmem:[#allocation6 + $0x28] sm:$0xff]   ;;  %v1696_v20 = vld [vmem:[%s2068_s6 + $0x14] ss:$8 sps:$4 sm:$0xff]   ;;  %v1700_v22 = vld [vmem:[%s2068_s6 + $0x10] ss:$8 sps:$4 sm:$0xff]   ;;  %p1798_p6 = pnand %p1797_p4, %p2008_p11  ;;  %p1804_p10 = scmp.lt.s32.totalorder %s1802_s25, %s1796_s8 }
  0x62   : > { %1471 = vmatprep.subr.bf16.mxu0 %v1678_v4  ;;  %1581 = vmatprep.subr.bf16.mxu1 %v1678_v4  ;;  %v1690_v18 = vld [vmem:[%s2068_s6] ss:$8 sps:$4 sm:$0xff]   ;;  %v1698_v21 = vld [vmem:[%s2068_s6 + $0x94] ss:$8 sps:$4 sm:$0xff]   ;;  %v1701_v23 = vld [vmem:[%s2068_s6 + $0x90] ss:$8 sps:$4 sm:$0xff]  }
  0x63   : > { %744 = vmatprep.mubr.bf16.mxu1 %v1695_v12  ;;  %v1693_v19 = vld [vmem:[%s2068_s6 + $0x80] ss:$8 sps:$4 sm:$0xff]   ;;  %v1702_v24 = vld [vmem:[%s2068_s6 + $0x24] ss:$8 sps:$4 sm:$0xff]   ;;  %v1708_v28 = vld [vmem:[%s2068_s6 + $0x34] ss:$8 sps:$4 sm:$0xff]   ;;  %p1799_p8 = pneg %p1798_p6  ;;  %p1805_p0 = por %p1804_p10, %p1803_p12 }
  0x64   : > { %v1704_v25 = vld [vmem:[%s2068_s6 + $0xa4] ss:$8 sps:$4 sm:$0xff]   ;;  %v1706_v26 = vld [vmem:[%s2068_s6 + $0x20] ss:$8 sps:$4 sm:$0xff]   ;;  %v1710_v29 = vld [vmem:[%s2068_s6 + $0xb4] ss:$8 sps:$4 sm:$0xff]  }
  0x65   : > { %1472 = vmatpush3.bf16.msra.mxu0 %v1679_v5  ;;  %1589 = vmatpush3.bf16.msra.mxu1 %v1679_v5  ;;  %v1707_v27 = vld [vmem:[%s2068_s6 + $0xa0] ss:$8 sps:$4 sm:$0xff]   ;;  %v1712_v30 = vld [vmem:[%s2068_s6 + $0x30] ss:$8 sps:$4 sm:$0xff]   ;;  %v1714_v32 = vld [vmem:[%s2068_s6 + $0x44] ss:$8 sps:$4 sm:$0xff]   ;;  %p1806_p5 = pnand %p1805_p0, %p1799_p8 }
  0x66   : > { %1473 = vmatprep.subr.bf16.mxu0 %v1680_v6  ;;  %1582 = vmatprep.subr.bf16.mxu1 %v1680_v6  ;;  %v1713_v31 = vld [vmem:[%s2068_s6 + $0xb0] ss:$8 sps:$4 sm:$0xff]   ;;  %v1716_v33 = vld [vmem:[%s2068_s6 + $0xc4] ss:$8 sps:$4 sm:$0xff]   ;;  %v1718_v34 = vld [vmem:[%s2068_s6 + $0x40] ss:$8 sps:$4 sm:$0xff]  }
  0x67   : > { %v1719_v35 = vld [vmem:[%s2068_s6 + $0xc0] ss:$8 sps:$4 sm:$0xff]   ;;  %v1720_v36 = vld [vmem:[%s2068_s6 + $0x54] ss:$8 sps:$4 sm:$0xff]   ;;  %v1724_v38 = vld [vmem:[%s2068_s6 + $0x50] ss:$8 sps:$4 sm:$0xff]  }
  0x68   : > { %v1722_v37 = vld [vmem:[%s2068_s6 + $0xd4] ss:$8 sps:$4 sm:$0xff]   ;;  %v1725_v39 = vld [vmem:[%s2068_s6 + $0xd0] ss:$8 sps:$4 sm:$0xff]   ;;  %v1726_v40 = vld [vmem:[%s2068_s6 + $0x64] ss:$8 sps:$4 sm:$0xff]  }
  0x69   : > { %1474 = vmatpush3.bf16.msra.mxu0 %v1681_v7  ;;  %1590 = vmatpush3.bf16.msra.mxu1 %v1681_v7  ;;  %v1728_v41 = vld [vmem:[%s2068_s6 + $0xe4] ss:$8 sps:$4 sm:$0xff]   ;;  %v1730_v42 = vld [vmem:[%s2068_s6 + $0x60] ss:$8 sps:$4 sm:$0xff]   ;;  %v1732_v44 = vld [vmem:[%s2068_s6 + $0x74] ss:$8 sps:$4 sm:$0xff]  }
  0x6a   : > { %1475 = vmatprep.subr.bf16.mxu0 %v1682_v8  ;;  %1583 = vmatprep.subr.bf16.mxu1 %v1682_v8  ;;  %v1731_v43 = vld [vmem:[%s2068_s6 + $0xe0] ss:$8 sps:$4 sm:$0xff]   ;;  %v1734_v45 = vld [vmem:[%s2068_s6 + $0xf4] ss:$8 sps:$4 sm:$0xff]   ;;  %v1736_v46 = vld [vmem:[%s2068_s6 + $0x70] ss:$8 sps:$4 sm:$0xff]  }
  0x6b   : > { %v1737_v47 = vld [vmem:[%s2068_s6 + $0xf0] ss:$8 sps:$4 sm:$0xff]   ;;  %v2113_v56 = vld [vmem:[%s2223_s2] ss:$0 sm:$0xff] }
  0x6d   : > { %1476 = vmatpush3.bf16.msra.mxu0 %v1683_v9  ;;  %1591 = vmatpush3.bf16.msra.mxu1 %v1683_v9 }
  0x6e   : > { %1477 = vmatprep.subr.bf16.mxu0 %v1684_v10  ;;  %1584 = vmatprep.subr.bf16.mxu1 %v1684_v10 }
  0x71   : > { %1478 = vmatpush3.bf16.msra.mxu0 %v1685_v13  ;;  %1592 = vmatpush3.bf16.msra.mxu1 %v1685_v13 }
  0x72   : > { %1479 = vmatprep.subr.bf16.mxu0 %v1686_v14  ;;  %1585 = vmatprep.subr.bf16.mxu1 %v1686_v14 }
  0x75   : > { %1480 = vmatpush3.bf16.msra.mxu0 %v1687_v15  ;;  %1593 = vmatpush3.bf16.msra.mxu1 %v1687_v15 }
  0x76   : > { %1481 = vmatprep.subr.bf16.mxu0 %v1688_v16  ;;  %1586 = vmatprep.subr.bf16.mxu1 %v1688_v16 }
  0x79   : > { %1482 = vmatpush3.bf16.msra.mxu0 %v1689_v17  ;;  %1594 = vmatpush3.bf16.msra.mxu1 %v1689_v17 }
  0x7c   : > { %681 = vmatmul.mubr.bf16.vlgmr.msra.gmra.mrb[0].mxu0 %v1690_v18  ;;  %745 = vmatmul.mubr.bf16.vlgmr.msra.gmra.mrb[0].mxu1 %v1693_v19 }
  0x7d   : > { %688 = vmatprep.mubr.bf16.mxu0 %v1696_v20  ;;  %752 = vmatprep.mubr.bf16.mxu1 %v1698_v21 }
  0x84   : > { %689 = vmatmul.mubr.bf16.gmra.mrb[4].mxu0 %v1700_v22  ;;  %753 = vmatmul.mubr.bf16.gmra.mrb[4].mxu1 %v1701_v23 }
  0x85   : > { %696 = vmatprep.mubr.bf16.mxu0 %v1702_v24  ;;  %760 = vmatprep.mubr.bf16.mxu1 %v1704_v25 }
  0x8c   : > { %697 = vmatmul.mubr.bf16.gmra.mrb[8].mxu0 %v1706_v26  ;;  %761 = vmatmul.mubr.bf16.gmra.mrb[8].mxu1 %v1707_v27 }
  0x8d   : > { %704 = vmatprep.mubr.bf16.mxu0 %v1708_v28  ;;  %768 = vmatprep.mubr.bf16.mxu1 %v1710_v29 }
  0x94   : > { %705 = vmatmul.mubr.bf16.gmra.mrb[12].mxu0 %v1712_v30  ;;  %769 = vmatmul.mubr.bf16.gmra.mrb[12].mxu1 %v1713_v31 }
  0x95   : > { %712 = vmatprep.mubr.bf16.mxu0 %v1714_v32  ;;  %776 = vmatprep.mubr.bf16.mxu1 %v1716_v33 }
  0x9c   : > { %713 = vmatmul.mubr.bf16.gmra.mrb[16].mxu0 %v1718_v34  ;;  %777 = vmatmul.mubr.bf16.gmra.mrb[16].mxu1 %v1719_v35 }
  0x9d   : > { %720 = vmatprep.mubr.bf16.mxu0 %v1720_v36  ;;  %784 = vmatprep.mubr.bf16.mxu1 %v1722_v37 }
  0xa4   : > { %721 = vmatmul.mubr.bf16.gmra.mrb[20].mxu0 %v1724_v38  ;;  %785 = vmatmul.mubr.bf16.gmra.mrb[20].mxu1 %v1725_v39 }
  0xa5   : > { %728 = vmatprep.mubr.bf16.mxu0 %v1726_v40  ;;  %792 = vmatprep.mubr.bf16.mxu1 %v1728_v41 }
  0xac   : > { %729 = vmatmul.mubr.bf16.gmra.mrb[24].mxu0 %v1730_v42  ;;  %793 = vmatmul.mubr.bf16.gmra.mrb[24].mxu1 %v1731_v43 }
  0xad   : > { %736 = vmatprep.mubr.bf16.mxu0 %v1732_v44  ;;  %800 = vmatprep.mubr.bf16.mxu1 %v1734_v45 }
  0xb4   : > { %737 = vmatmul.mubr.bf16.gmra.mrb[28].mxu0 %v1736_v46  ;;  %801 = vmatmul.mubr.bf16.gmra.mrb[28].mxu1 %v1737_v47 }
 0x14f   : > { %v1483_v48 = vpop.f32.mrb[0].mxu0  ;;  %v1531_v49 = vpop.f32.mrb[0].mxu1 }
 0x150   : > { %v1484_v50 = vpop.f32.mrb[1].mxu0  ;;  %v1532_v51 = vpop.f32.mrb[1].mxu1 }
 0x151   : > { %v1485_v52 = vadd.f32 %v1484_v50, %v1483_v48  ;;  %v1533_v53 = vadd.f32 %v1532_v51, %v1531_v49  ;;  %v1486_v54 = vpop.f32.mrb[2].mxu0  ;;  %v1534_v55 = vpop.f32.mrb[2].mxu1 }
 0x152   : > { %v1487_v57 = vpop.f32.mrb[3].mxu0  ;;  %v1535_v58 = vpop.f32.mrb[3].mxu1 }
 0x153   : > { %v1488_v59 = vadd.f32 %v1487_v57, %v1486_v54  ;;  %v1536_v60 = vadd.f32 %v1535_v58, %v1534_v55  ;;  %v915_v61 = vadd.f32 %v1485_v52, %v2113_v56  ;;  %v931_v62 = vadd.f32 %v1533_v53, %v2113_v56 }
 0x155   : > { %v916_v63 = vadd.f32 %v1488_v59, %v2113_v56  ;;  %v932_v0 = vadd.f32 %v1536_v60, %v2113_v56 }
 0x157   : > { %v1375_v1 = vpack.c.bf16 %v916_v63, %v915_v61  ;;  %v1415_v2 = vpack.c.bf16 %v932_v0, %v931_v62  ;;  %v1489_v3 = vpop.f32.mrb[4].mxu0  ;;  %v1537_v4 = vpop.f32.mrb[4].mxu1 }
 0x158   : > { %v1490_v5 = vpop.f32.mrb[5].mxu0  ;;  %v1538_v6 = vpop.f32.mrb[5].mxu1 }
 0x159   : > { %1376 = vst [vmem:[%s2120_s9] sm:$0xff] %v1375_v1   ;;  %1459 = vst [vmem:[%s2120_s9 + $0x40] sm:$0xff] %v1415_v2   ;;  %v1491_v7 = vadd.f32 %v1490_v5, %v1489_v3  ;;  %v1539_v8 = vadd.f32 %v1538_v6, %v1537_v4  ;;  %v1492_v9 = vpop.f32.mrb[6].mxu0  ;;  %v1540_v10 = vpop.f32.mrb[6].mxu1 }
 0x15a   : > { %v1493_v11 = vpop.f32.mrb[7].mxu0  ;;  %v1541_v12 = vpop.f32.mrb[7].mxu1 }
 0x15b   : > { %v1494_v13 = vadd.f32 %v1493_v11, %v1492_v9  ;;  %v1542_v14 = vadd.f32 %v1541_v12, %v1540_v10  ;;  %v917_v15 = vadd.f32 %v1491_v7, %v2113_v56  ;;  %v933_v16 = vadd.f32 %v1539_v8, %v2113_v56 }
 0x15d   : > { %v918_v17 = vadd.f32 %v1494_v13, %v2113_v56  ;;  %v934_v18 = vadd.f32 %v1542_v14, %v2113_v56 }
 0x15f   : > { %v1380_v19 = vpack.c.bf16 %v918_v17, %v917_v15  ;;  %v1420_v20 = vpack.c.bf16 %v934_v18, %v933_v16  ;;  %v1495_v21 = vpop.f32.mrb[8].mxu0  ;;  %v1543_v22 = vpop.f32.mrb[8].mxu1 }
 0x160   : > { %v1496_v23 = vpop.f32.mrb[9].mxu0  ;;  %v1544_v24 = vpop.f32.mrb[9].mxu1 }
 0x161   : > { %1452 = vst [vmem:[%s2120_s9 + $0x8] sm:$0xff] %v1380_v19   ;;  %1460 = vst [vmem:[%s2120_s9 + $0x48] sm:$0xff] %v1420_v20   ;;  %v1497_v25 = vadd.f32 %v1496_v23, %v1495_v21  ;;  %v1545_v26 = vadd.f32 %v1544_v24, %v1543_v22  ;;  %v1498_v27 = vpop.f32.mrb[10].mxu0  ;;  %v1546_v28 = vpop.f32.mrb[10].mxu1 }
 0x162   : > { %v1499_v29 = vpop.f32.mrb[11].mxu0  ;;  %v1547_v30 = vpop.f32.mrb[11].mxu1 }
 0x163   : > { %v1500_v31 = vadd.f32 %v1499_v29, %v1498_v27  ;;  %v1548_v32 = vadd.f32 %v1547_v30, %v1546_v28  ;;  %v919_v33 = vadd.f32 %v1497_v25, %v2113_v56  ;;  %v935_v34 = vadd.f32 %v1545_v26, %v2113_v56 }
 0x165   : > { %v920_v35 = vadd.f32 %v1500_v31, %v2113_v56  ;;  %v936_v36 = vadd.f32 %v1548_v32, %v2113_v56 }
 0x167   : > { %v1385_v37 = vpack.c.bf16 %v920_v35, %v919_v33  ;;  %v1425_v38 = vpack.c.bf16 %v936_v36, %v935_v34  ;;  %v1501_v39 = vpop.f32.mrb[12].mxu0  ;;  %v1549_v40 = vpop.f32.mrb[12].mxu1 }
 0x168   : > { %v1502_v41 = vpop.f32.mrb[13].mxu0  ;;  %v1550_v42 = vpop.f32.mrb[13].mxu1 }
 0x169   : > { %1453 = vst [vmem:[%s2120_s9 + $0x10] sm:$0xff] %v1385_v37   ;;  %1461 = vst [vmem:[%s2120_s9 + $0x50] sm:$0xff] %v1425_v38   ;;  %v1503_v43 = vadd.f32 %v1502_v41, %v1501_v39  ;;  %v1551_v44 = vadd.f32 %v1550_v42, %v1549_v40  ;;  %v1504_v45 = vpop.f32.mrb[14].mxu0  ;;  %v1552_v46 = vpop.f32.mrb[14].mxu1 }
 0x16a   : > { %v1505_v47 = vpop.f32.mrb[15].mxu0  ;;  %v1553_v48 = vpop.f32.mrb[15].mxu1 }
 0x16b   : > { %v1506_v49 = vadd.f32 %v1505_v47, %v1504_v45  ;;  %v1554_v50 = vadd.f32 %v1553_v48, %v1552_v46  ;;  %v921_v51 = vadd.f32 %v1503_v43, %v2113_v56  ;;  %v937_v52 = vadd.f32 %v1551_v44, %v2113_v56 }
 0x16d   : > { %v922_v53 = vadd.f32 %v1506_v49, %v2113_v56  ;;  %v938_v54 = vadd.f32 %v1554_v50, %v2113_v56 }
 0x16f   : > { %v1390_v55 = vpack.c.bf16 %v922_v53, %v921_v51  ;;  %v1430_v57 = vpack.c.bf16 %v938_v54, %v937_v52  ;;  %v1507_v58 = vpop.f32.mrb[16].mxu0  ;;  %v1555_v59 = vpop.f32.mrb[16].mxu1 }
 0x170   : > { %v1508_v60 = vpop.f32.mrb[17].mxu0  ;;  %v1556_v61 = vpop.f32.mrb[17].mxu1 }
 0x171   : > { %1454 = vst [vmem:[%s2120_s9 + $0x18] sm:$0xff] %v1390_v55   ;;  %1462 = vst [vmem:[%s2120_s9 + $0x58] sm:$0xff] %v1430_v57   ;;  %v1509_v62 = vadd.f32 %v1508_v60, %v1507_v58  ;;  %v1557_v63 = vadd.f32 %v1556_v61, %v1555_v59  ;;  %v1510_v0 = vpop.f32.mrb[18].mxu0  ;;  %v1558_v1 = vpop.f32.mrb[18].mxu1 }
 0x172   : > { %v1511_v2 = vpop.f32.mrb[19].mxu0  ;;  %v1559_v3 = vpop.f32.mrb[19].mxu1 }
 0x173   : > { %v1512_v4 = vadd.f32 %v1511_v2, %v1510_v0  ;;  %v1560_v5 = vadd.f32 %v1559_v3, %v1558_v1  ;;  %v923_v6 = vadd.f32 %v1509_v62, %v2113_v56  ;;  %v939_v7 = vadd.f32 %v1557_v63, %v2113_v56 }
 0x175   : > { %v924_v8 = vadd.f32 %v1512_v4, %v2113_v56  ;;  %v940_v9 = vadd.f32 %v1560_v5, %v2113_v56 }
 0x177   : > { %v1395_v10 = vpack.c.bf16 %v924_v8, %v923_v6  ;;  %v1435_v11 = vpack.c.bf16 %v940_v9, %v939_v7  ;;  %v1513_v12 = vpop.f32.mrb[20].mxu0  ;;  %v1561_v13 = vpop.f32.mrb[20].mxu1 }
 0x178   : > { %v1514_v14 = vpop.f32.mrb[21].mxu0  ;;  %v1562_v15 = vpop.f32.mrb[21].mxu1 }
 0x179   : > { %1455 = vst [vmem:[%s2120_s9 + $0x20] sm:$0xff] %v1395_v10   ;;  %1463 = vst [vmem:[%s2120_s9 + $0x60] sm:$0xff] %v1435_v11   ;;  %v1515_v16 = vadd.f32 %v1514_v14, %v1513_v12  ;;  %v1563_v17 = vadd.f32 %v1562_v15, %v1561_v13  ;;  %v1516_v18 = vpop.f32.mrb[22].mxu0  ;;  %v1564_v19 = vpop.f32.mrb[22].mxu1 }
 0x17a   : > { %v1517_v20 = vpop.f32.mrb[23].mxu0  ;;  %v1565_v21 = vpop.f32.mrb[23].mxu1 }
 0x17b   : > { %v1518_v22 = vadd.f32 %v1517_v20, %v1516_v18  ;;  %v1566_v23 = vadd.f32 %v1565_v21, %v1564_v19  ;;  %v925_v24 = vadd.f32 %v1515_v16, %v2113_v56  ;;  %v941_v25 = vadd.f32 %v1563_v17, %v2113_v56 }
 0x17d   : > { %v926_v26 = vadd.f32 %v1518_v22, %v2113_v56  ;;  %v942_v27 = vadd.f32 %v1566_v23, %v2113_v56 }
 0x17f   : > { %v1400_v28 = vpack.c.bf16 %v926_v26, %v925_v24  ;;  %v1440_v29 = vpack.c.bf16 %v942_v27, %v941_v25  ;;  %v1519_v30 = vpop.f32.mrb[24].mxu0  ;;  %v1567_v31 = vpop.f32.mrb[24].mxu1 }
 0x180   : > { %v1520_v32 = vpop.f32.mrb[25].mxu0  ;;  %v1568_v33 = vpop.f32.mrb[25].mxu1 }
 0x181   : > { %1456 = vst [vmem:[%s2120_s9 + $0x28] sm:$0xff] %v1400_v28   ;;  %1464 = vst [vmem:[%s2120_s9 + $0x68] sm:$0xff] %v1440_v29   ;;  %v1521_v34 = vadd.f32 %v1520_v32, %v1519_v30  ;;  %v1569_v35 = vadd.f32 %v1568_v33, %v1567_v31  ;;  %v1522_v36 = vpop.f32.mrb[26].mxu0  ;;  %v1570_v37 = vpop.f32.mrb[26].mxu1 }
 0x182   : > { %v1523_v38 = vpop.f32.mrb[27].mxu0  ;;  %v1571_v39 = vpop.f32.mrb[27].mxu1 }
 0x183   : > { %v1524_v40 = vadd.f32 %v1523_v38, %v1522_v36  ;;  %v1572_v41 = vadd.f32 %v1571_v39, %v1570_v37  ;;  %v927_v42 = vadd.f32 %v1521_v34, %v2113_v56  ;;  %v943_v43 = vadd.f32 %v1569_v35, %v2113_v56 }
 0x185   : > { %v928_v44 = vadd.f32 %v1524_v40, %v2113_v56  ;;  %v944_v45 = vadd.f32 %v1572_v41, %v2113_v56 }
 0x187   : > { %v1405_v46 = vpack.c.bf16 %v928_v44, %v927_v42  ;;  %v1445_v47 = vpack.c.bf16 %v944_v45, %v943_v43  ;;  %v1525_v48 = vpop.f32.mrb[28].mxu0  ;;  %v1573_v49 = vpop.f32.mrb[28].mxu1 }
 0x188   : > { %v1526_v50 = vpop.f32.mrb[29].mxu0  ;;  %v1574_v51 = vpop.f32.mrb[29].mxu1 }
 0x189   : > { %1457 = vst [vmem:[%s2120_s9 + $0x30] sm:$0xff] %v1405_v46   ;;  %1465 = vst [vmem:[%s2120_s9 + $0x70] sm:$0xff] %v1445_v47   ;;  %v1527_v52 = vadd.f32 %v1526_v50, %v1525_v48  ;;  %v1575_v53 = vadd.f32 %v1574_v51, %v1573_v49  ;;  %v1528_v54 = vpop.f32.mrb[30].mxu0  ;;  %v1576_v55 = vpop.f32.mrb[30].mxu1 }
 0x18a   : > { %v1529_v57 = vpop.f32.mrb[31].mxu0  ;;  %v1577_v58 = vpop.f32.mrb[31].mxu1 }
 0x18b   : > { %v1530_v59 = vadd.f32 %v1529_v57, %v1528_v54  ;;  %v1578_v60 = vadd.f32 %v1577_v58, %v1576_v55  ;;  %v929_v61 = vadd.f32 %v1527_v52, %v2113_v56  ;;  %v945_v62 = vadd.f32 %v1575_v53, %v2113_v56 }
 0x18d   : > { %v930_v63 = vadd.f32 %v1530_v59, %v2113_v56  ;;  %v946_v0 = vadd.f32 %v1578_v60, %v2113_v56 }
 0x18f   : > { %v1410_v1 = vpack.c.bf16 %v930_v63, %v929_v61  ;;  %v1450_v2 = vpack.c.bf16 %v946_v0, %v945_v62 }
 0x191   : > { %1458 = vst [vmem:[%s2120_s9 + $0x38] sm:$0xff] %v1410_v1   ;;  %1466 = vst [vmem:[%s2120_s9 + $0x78] sm:$0xff] %v1450_v2  }
 0x192   : > { %1809 = shalt.err (!%p1806_p5)
}
 0x193   : > { %s1810_s29 = scalar_lea.hbm %s2169_s7, 2048  ;;  %s1814_s20 = scalar_lea.hbm %s2224_s3, 16384 }
 0x194   : > { %p1811_p9 = scmp.ne.s32.totalorder %s2169_s7, %s1810_s29  ;;  %p1815_p3 = scmp.lt.u32.totalorder %s2169_s7, %s2224_s3 }
 0x195   : > { %p1816_p7 = scmp.lt.u32.totalorder %s1814_s20, %s1810_s29  ;;  %p1818_p4 = scmp.lt.u32.totalorder %s1810_s29, %s2169_s7 }
 0x196   : > { %p1812_p1 = pnand %p1811_p9, %p2008_p11 }
 0x197   : > { %p1817_p13 = por %p1816_p7, %p1815_p3 }
 0x198   : > { %p1813_p2 = pneg %p1812_p1 }
 0x199   : > { %p1819_p6 = por %p1818_p4, %p1817_p13 }
 0x19b   : > { %p1820_p8 = pnand %p1819_p6, %p1813_p2 }
 0x19d   : > { %1823 = shalt.err (!%p1820_p8)
}
 0x19e   : > { %s1891_s9 = smov 64   ;;  %s1892_s10 = smov 4  }
 0x19f   : > { %1601 = dma.vmem_to_hbm [thread:$0]  (%p2008_p11), %s2171_s11, 2048, %s2169_s7, %s1108_s15, %s1891_s9, %s1891_s9, %s1892_s10  }
 0x1a0 PF: > { %p1618_p12 = scmp.ge.s32.totalorder %s1882_s17, 2  ;;  %s1137_s18 = sand.u32 1, %s1862_s12  }
 0x1a1   : > { %p2242_p10 = scmp.ne.s32.totalorder %s2232_s23, 0  ;;  %s1138_s26 = scalar_lea.sflag [#allocation5], %s1137_s18 }
 0x1a3   : > { %p1612_p0 = pnand %p1618_p12, %p2242_p10 }
 0x1a5   : > { %1857 = dma.done.wait (!%p1612_p0), %s1138_s26, 2048  }
 0x1a6   : > { %1859 = vsyncadd (!%p1612_p0), %s1138_s26, 4294965248  ;;  %s20_s17 = sadd.s32 1, %s1882_s17   ;;  %s2243_s12 = smov %s1866_s13 }
 0x1a7   : > { %p17_p5 = scmp.ge.s32.totalorder %s20_s17, 10   ;;  %s2244_s13 = smov %s1870_s14 }
 0x1a8   : > { %s2245_s14 = smov %s2017_s5  ;;  %s2246_s15 = smov %s1878_s16 }
 0x1a9   : > { %s2247_s16 = smov %s2249_s28  ;;  %19 = sbr.rel (!%p17_p5) target bundleno = 7 (0x7), region = 93 }
 0x1b0   :  { %1143 = vsyncpa [#allocation4], 1 }
 0x1b1   :  { %1145 = vsyncpa [#allocation4 + $0x1], 1 }
 0x1b2   :  { %1146 = vsyncpa [#allocation7], 1 }
 0x1b3   :  { %1147 = vsyncpa [#allocation5], 1 }
 0x1b4   :  { %1149 = vsyncpa [#allocation5 + $0x1], 1 }

</bundles_post_ra>
